<compile_context>
chip_gen: v7x
topology: tpu7x:2x2x1
jax: 0.10.0
libtpu: 0.0.40
codegen_flags: <defaults>
</compile_context>

<pallas_src>
import functools

import jax
import jax.numpy as jnp
from jax.experimental import pallas as pl
from jax.experimental.pallas import tpu as pltpu


def _mlp_kernel(x_ref, w1_ref, b1_ref, w2_ref, b2_ref, w3_ref, b3_ref,
                w4_ref, b4_ref, bound_ref, o_ref):
    """o = sigmoid(relu(relu(relu(x@W1+b1)@W2+b2)@W3+b3)@W4+b4) * bound."""
    x = x_ref[...].astype(jnp.bfloat16)

    h = jnp.dot(x, w1_ref[...], preferred_element_type=jnp.float32) + b1_ref[...]
    h = jnp.maximum(h, 0.0)

    h = jnp.dot(h.astype(jnp.bfloat16), w2_ref[...],
                preferred_element_type=jnp.float32) + b2_ref[...]
    h = jnp.maximum(h, 0.0)

    h = jnp.dot(h.astype(jnp.bfloat16), w3_ref[...],
                preferred_element_type=jnp.float32) + b3_ref[...]
    h = jnp.maximum(h, 0.0)

    logits = jnp.dot(h.astype(jnp.bfloat16), w4_ref[...],
                     preferred_element_type=jnp.float32) + b4_ref[...]
    # sigmoid lowers to exp+recip on the EUP (separate bundle slot -> cheap).
    o_ref[...] = (jax.nn.sigmoid(logits) * bound_ref[...]).astype(o_ref.dtype)


def _round_up(x, m):
    return (x + m - 1) // m * m


@functools.partial(jax.jit, static_argnames=("block_b",))
def continuous_mlp_forward(state, params, bound, *, block_b=128):
    """ContinuousMLP forward via a fused Pallas TPU kernel.

    state:  [B, D_in] float32
    params: dict with w1..w4 stored as [in, out] and b1..b4 as [1, out], float32
    bound:  [1, n_action] float32
    returns [B, n_action] float32
    """
    B, D_in = state.shape
    n_action = params["w4"].shape[1]

    # Batch tile: multiple of 8 (sublanes); clamp to the (padded) batch so a
    # small batch runs as a single grid step with no wasted rows beyond 8-align.
    eff_b = _round_up(min(block_b, _round_up(B, 8)), 8)
    B_pad = _round_up(B, eff_b)
    if B_pad != B:
        state = jnp.pad(state, ((0, B_pad - B), (0, 0)))

    # Lane-dense head: pad final layer to 128 output columns (unmasked stores),
    # slice the real n_action columns back out in JAX.
    n_out = _round_up(max(n_action, 128), 128)
    pad_c = n_out - n_action

    # bf16 weights: MXU-native on v5e/v6e/v7x, halves resident weight bytes.
    w1 = params["w1"].astype(jnp.bfloat16)
    w2 = params["w2"].astype(jnp.bfloat16)
    w3 = params["w3"].astype(jnp.bfloat16)
    w4 = jnp.pad(params["w4"], ((0, 0), (0, pad_c))).astype(jnp.bfloat16)
    b1, b2, b3 = params["b1"], params["b2"], params["b3"]
    b4 = jnp.pad(params["b4"], ((0, 0), (0, pad_c)))
    bound_p = jnp.pad(bound.astype(jnp.float32), ((0, 0), (0, pad_c)))

    def batch_map(i):
        return (i, 0)

    def whole_map(i):
        return (0, 0)

    # Constant index_map -> weights/biases/bound resident across the grid.
    resident_specs = [pl.BlockSpec(a.shape, whole_map)
                      for a in (w1, b1, w2, b2, w3, b3, w4, b4, bound_p)]

    out = pl.pallas_call(
        _mlp_kernel,
        out_shape=jax.ShapeDtypeStruct((B_pad, n_out), jnp.float32),
        grid_spec=pltpu.PrefetchScalarGridSpec(
            num_scalar_prefetch=0,
            grid=(B_pad // eff_b,),
            in_specs=[pl.BlockSpec((eff_b, D_in), batch_map)] + resident_specs,
            out_specs=pl.BlockSpec((eff_b, n_out), batch_map),
        ),
        compiler_params=pltpu.CompilerParams(
            dimension_semantics=("parallel",),
        ),
    )(state, w1, b1, w2, b2, w3, b3, w4, b4, bound_p)

    return out[:B, :n_action]


def init_params(key, input_shape, n_action):
    """Deterministic init mimicking PyTorch nn.Linear default U[-1/sqrt(fan_in), +]."""
    dims = [(input_shape, 256), (256, 128), (128, 128), (128, n_action)]
    params = {}
    for idx, (fan_in, fan_out) in enumerate(dims, start=1):
        key, kw, kb = jax.random.split(key, 3)
        lim = 1.0 / jnp.sqrt(jnp.float32(fan_in))
        # Stored as [in, out] (transpose of PyTorch [out, in]) so kernel does x @ W.
        params[f"w{idx}"] = jax.random.uniform(
            kw, (fan_in, fan_out), jnp.float32, -lim, lim)
        params[f"b{idx}"] = jax.random.uniform(
            kb, (1, fan_out), jnp.float32, -lim, lim)
    return params


def reference_forward(state, params, bound):
    h = jnp.maximum(state @ params["w1"] + params["b1"], 0.0)
    h = jnp.maximum(h @ params["w2"] + params["b2"], 0.0)
    h = jnp.maximum(h @ params["w3"] + params["b3"], 0.0)
    act = jax.nn.sigmoid(h @ params["w4"] + params["b4"])
    return act * bound


if __name__ == "__main__":
    key = jax.random.PRNGKey(0)
    key, k_state, k_params = jax.random.split(key, 3)

    # Shapes consistent with the module: args.input_shape[agent]=32,
    # args.n_actions[agent]=4, args.max_action[agent]=per-action bound.
    # batch=256 -> two 128-row grid steps (exercises pipelining / v7x split).
    batch = 256
    input_shape = 32
    n_action = 4

    state = jax.random.normal(k_state, (batch, input_shape), jnp.float32)
    params = init_params(k_params, input_shape, n_action)
    bound = jnp.array([[1.0, 2.0, 0.5, 3.0]], dtype=jnp.float32)  # [1, n_action]

    out = continuous_mlp_forward(state, params, bound)
    out = jax.block_until_ready(out)
    ref = reference_forward(state, params, bound)
    assert out.shape == (batch, n_action)
    # bf16 MXU operands (f32 accumulation) vs pure-f32 reference -> loosened tol.
    assert jnp.allclose(out, ref, atol=3e-2, rtol=3e-2), "mismatch vs reference"

    # Ragged batch exercises the pad-to-tile / slice path (single grid step).
    state_r = jax.random.normal(key, (50, input_shape), jnp.float32)
    out_r = jax.block_until_ready(continuous_mlp_forward(state_r, params, bound))
    ref_r = reference_forward(state_r, params, bound)
    assert out_r.shape == (50, n_action)
    assert jnp.allclose(out_r, ref_r, atol=3e-2, rtol=3e-2), "mismatch (ragged batch)"

    print("KERNEL_OK")
</pallas_src>

<mosaic_0001>
module attributes {stable_mosaic.version = 11 : i64} {
  func.func @_mlp_kernel(%arg0: i32, %arg1: memref<128x32xf32, #tpu.memory_space<vmem>>, %arg2: memref<32x256xbf16, #tpu.memory_space<vmem>>, %arg3: memref<1x256xf32, #tpu.memory_space<vmem>>, %arg4: memref<256x128xbf16, #tpu.memory_space<vmem>>, %arg5: memref<1x128xf32, #tpu.memory_space<vmem>>, %arg6: memref<128x128xbf16, #tpu.memory_space<vmem>>, %arg7: memref<1x128xf32, #tpu.memory_space<vmem>>, %arg8: memref<128x128xbf16, #tpu.memory_space<vmem>>, %arg9: memref<1x128xf32, #tpu.memory_space<vmem>>, %arg10: memref<1x128xf32, #tpu.memory_space<vmem>>, %arg11: memref<128x128xf32, #tpu.memory_space<vmem>>) attributes {dimension_semantics = [#tpu.dimension_semantics<parallel>], iteration_bounds = array<i64: 2>, scalar_prefetch = 0 : i64, scratch_operands = 0 : i64, tpu.core_type = #tpu.core_type<tc>, window_params = [{transform_indices = @transform_0, window_bounds = array<i64: 128, 32>}, {pipeline_mode = #tpu.pipeline_mode<synchronous>, transform_indices = @transform_1, window_bounds = array<i64: 32, 256>}, {pipeline_mode = #tpu.pipeline_mode<synchronous>, transform_indices = @transform_2, window_bounds = array<i64: 1, 256>}, {pipeline_mode = #tpu.pipeline_mode<synchronous>, transform_indices = @transform_3, window_bounds = array<i64: 256, 128>}, {pipeline_mode = #tpu.pipeline_mode<synchronous>, transform_indices = @transform_4, window_bounds = array<i64: 1, 128>}, {pipeline_mode = #tpu.pipeline_mode<synchronous>, transform_indices = @transform_5, window_bounds = array<i64: 128, 128>}, {pipeline_mode = #tpu.pipeline_mode<synchronous>, transform_indices = @transform_6, window_bounds = array<i64: 1, 128>}, {pipeline_mode = #tpu.pipeline_mode<synchronous>, transform_indices = @transform_7, window_bounds = array<i64: 128, 128>}, {pipeline_mode = #tpu.pipeline_mode<synchronous>, transform_indices = @transform_8, window_bounds = array<i64: 1, 128>}, {pipeline_mode = #tpu.pipeline_mode<synchronous>, transform_indices = @transform_9, window_bounds = array<i64: 1, 128>}, {transform_indices = @transform_10, window_bounds = array<i64: 128, 128>}]} {
    %c0 = arith.constant 0 : index
    %c0_0 = arith.constant 0 : index
    %0 = vector.load %arg1[%c0, %c0_0] : memref<128x32xf32, #tpu.memory_space<vmem>>, vector<128x32xf32>
    %1 = arith.truncf %0 : vector<128x32xf32> to vector<128x32xbf16>
    %c0_1 = arith.constant 0 : index
    %c0_2 = arith.constant 0 : index
    %2 = vector.load %arg2[%c0_1, %c0_2] : memref<32x256xbf16, #tpu.memory_space<vmem>>, vector<32x256xbf16>
    %cst = arith.constant dense<0.000000e+00> : vector<128x256xf32>
    %3 = tpu.matmul %1, %2, %cst {dimension_numbers = #tpu.dot_dimension_numbers<[1], [0], [0], [1], [0, 0, 1, 1], [], []>} : vector<128x32xbf16>, vector<32x256xbf16>, vector<128x256xf32> -> vector<128x256xf32>
    %c0_3 = arith.constant 0 : index
    %c0_4 = arith.constant 0 : index
    %4 = vector.load %arg3[%c0_3, %c0_4] : memref<1x256xf32, #tpu.memory_space<vmem>>, vector<1x256xf32>
    %5 = vector.broadcast %4 : vector<1x256xf32> to vector<128x256xf32>
    %6 = arith.addf %3, %5 : vector<128x256xf32>
    %cst_5 = arith.constant 0.000000e+00 : f32
    %7 = vector.broadcast %cst_5 : f32 to vector<128x256xf32>
    %8 = arith.maximumf %6, %7 : vector<128x256xf32>
    %9 = arith.truncf %8 : vector<128x256xf32> to vector<128x256xbf16>
    %c0_6 = arith.constant 0 : index
    %c0_7 = arith.constant 0 : index
    %10 = vector.load %arg4[%c0_6, %c0_7] : memref<256x128xbf16, #tpu.memory_space<vmem>>, vector<256x128xbf16>
    %cst_8 = arith.constant dense<0.000000e+00> : vector<128x128xf32>
    %11 = tpu.matmul %9, %10, %cst_8 {dimension_numbers = #tpu.dot_dimension_numbers<[1], [0], [0], [1], [0, 0, 1, 1], [], []>} : vector<128x256xbf16>, vector<256x128xbf16>, vector<128x128xf32> -> vector<128x128xf32>
    %c0_9 = arith.constant 0 : index
    %c0_10 = arith.constant 0 : index
    %12 = vector.load %arg5[%c0_9, %c0_10] : memref<1x128xf32, #tpu.memory_space<vmem>>, vector<1x128xf32>
    %13 = vector.broadcast %12 : vector<1x128xf32> to vector<128x128xf32>
    %14 = arith.addf %11, %13 : vector<128x128xf32>
    %cst_11 = arith.constant 0.000000e+00 : f32
    %15 = vector.broadcast %cst_11 : f32 to vector<128x128xf32>
    %16 = arith.maximumf %14, %15 : vector<128x128xf32>
    %17 = arith.truncf %16 : vector<128x128xf32> to vector<128x128xbf16>
    %c0_12 = arith.constant 0 : index
    %c0_13 = arith.constant 0 : index
    %18 = vector.load %arg6[%c0_12, %c0_13] : memref<128x128xbf16, #tpu.memory_space<vmem>>, vector<128x128xbf16>
    %cst_14 = arith.constant dense<0.000000e+00> : vector<128x128xf32>
    %19 = tpu.matmul %17, %18, %cst_14 {dimension_numbers = #tpu.dot_dimension_numbers<[1], [0], [0], [1], [0, 0, 1, 1], [], []>} : vector<128x128xbf16>, vector<128x128xbf16>, vector<128x128xf32> -> vector<128x128xf32>
    %c0_15 = arith.constant 0 : index
    %c0_16 = arith.constant 0 : index
    %20 = vector.load %arg7[%c0_15, %c0_16] : memref<1x128xf32, #tpu.memory_space<vmem>>, vector<1x128xf32>
    %21 = vector.broadcast %20 : vector<1x128xf32> to vector<128x128xf32>
    %22 = arith.addf %19, %21 : vector<128x128xf32>
    %cst_17 = arith.constant 0.000000e+00 : f32
    %23 = vector.broadcast %cst_17 : f32 to vector<128x128xf32>
    %24 = arith.maximumf %22, %23 : vector<128x128xf32>
    %25 = arith.truncf %24 : vector<128x128xf32> to vector<128x128xbf16>
    %c0_18 = arith.constant 0 : index
    %c0_19 = arith.constant 0 : index
    %26 = vector.load %arg8[%c0_18, %c0_19] : memref<128x128xbf16, #tpu.memory_space<vmem>>, vector<128x128xbf16>
    %cst_20 = arith.constant dense<0.000000e+00> : vector<128x128xf32>
    %27 = tpu.matmul %25, %26, %cst_20 {dimension_numbers = #tpu.dot_dimension_numbers<[1], [0], [0], [1], [0, 0, 1, 1], [], []>} : vector<128x128xbf16>, vector<128x128xbf16>, vector<128x128xf32> -> vector<128x128xf32>
    %c0_21 = arith.constant 0 : index
    %c0_22 = arith.constant 0 : index
    %28 = vector.load %arg9[%c0_21, %c0_22] : memref<1x128xf32, #tpu.memory_space<vmem>>, vector<1x128xf32>
    %29 = vector.broadcast %28 : vector<1x128xf32> to vector<128x128xf32>
    %30 = arith.addf %27, %29 : vector<128x128xf32>
    %31 = arith.negf %30 : vector<128x128xf32>
    %32 = math.exp %31 : vector<128x128xf32>
    %cst_23 = arith.constant 1.000000e+00 : f32
    %33 = vector.broadcast %cst_23 : f32 to vector<128x128xf32>
    %34 = arith.addf %33, %32 : vector<128x128xf32>
    %35 = arith.divf %33, %34 : vector<128x128xf32>
    %c0_24 = arith.constant 0 : index
    %c0_25 = arith.constant 0 : index
    %36 = vector.load %arg10[%c0_24, %c0_25] : memref<1x128xf32, #tpu.memory_space<vmem>>, vector<1x128xf32>
    %37 = vector.broadcast %36 : vector<1x128xf32> to vector<128x128xf32>
    %38 = arith.mulf %35, %37 : vector<128x128xf32>
    %c0_26 = arith.constant 0 : index
    %c0_27 = arith.constant 0 : index
    %39 = vector.load %arg11[%c0_26, %c0_27] : memref<128x128xf32, #tpu.memory_space<vmem>>, vector<128x128xf32>
    tpu.vector_store %arg11[%c0_26, %c0_27], %38 {strides = array<i32>} : memref<128x128xf32, #tpu.memory_space<vmem>>, vector<128x128xf32>,
    return
  }
  func.func @transform_0(%arg0: i32) -> (i32, i32) {
    %c0_i32 = arith.constant 0 : i32
    %c0_i32_0 = arith.constant 0 : i32
    return %arg0, %c0_i32 : i32, i32
  }
  func.func @transform_1(%arg0: i32) -> (i32, i32) {
    %c0_i32 = arith.constant 0 : i32
    %c0_i32_0 = arith.constant 0 : i32
    %c0_i32_1 = arith.constant 0 : i32
    return %c0_i32, %c0_i32_0 : i32, i32
  }
  func.func @transform_2(%arg0: i32) -> (i32, i32) {
    %c0_i32 = arith.constant 0 : i32
    %c0_i32_0 = arith.constant 0 : i32
    %c0_i32_1 = arith.constant 0 : i32
    return %c0_i32, %c0_i32_0 : i32, i32
  }
  func.func @transform_3(%arg0: i32) -> (i32, i32) {
    %c0_i32 = arith.constant 0 : i32
    %c0_i32_0 = arith.constant 0 : i32
    %c0_i32_1 = arith.constant 0 : i32
    return %c0_i32, %c0_i32_0 : i32, i32
  }
  func.func @transform_4(%arg0: i32) -> (i32, i32) {
    %c0_i32 = arith.constant 0 : i32
    %c0_i32_0 = arith.constant 0 : i32
    %c0_i32_1 = arith.constant 0 : i32
    return %c0_i32, %c0_i32_0 : i32, i32
  }
  func.func @transform_5(%arg0: i32) -> (i32, i32) {
    %c0_i32 = arith.constant 0 : i32
    %c0_i32_0 = arith.constant 0 : i32
    %c0_i32_1 = arith.constant 0 : i32
    return %c0_i32, %c0_i32_0 : i32, i32
  }
  func.func @transform_6(%arg0: i32) -> (i32, i32) {
    %c0_i32 = arith.constant 0 : i32
    %c0_i32_0 = arith.constant 0 : i32
    %c0_i32_1 = arith.constant 0 : i32
    return %c0_i32, %c0_i32_0 : i32, i32
  }
  func.func @transform_7(%arg0: i32) -> (i32, i32) {
    %c0_i32 = arith.constant 0 : i32
    %c0_i32_0 = arith.constant 0 : i32
    %c0_i32_1 = arith.constant 0 : i32
    return %c0_i32, %c0_i32_0 : i32, i32
  }
  func.func @transform_8(%arg0: i32) -> (i32, i32) {
    %c0_i32 = arith.constant 0 : i32
    %c0_i32_0 = arith.constant 0 : i32
    %c0_i32_1 = arith.constant 0 : i32
    return %c0_i32, %c0_i32_0 : i32, i32
  }
  func.func @transform_9(%arg0: i32) -> (i32, i32) {
    %c0_i32 = arith.constant 0 : i32
    %c0_i32_0 = arith.constant 0 : i32
    %c0_i32_1 = arith.constant 0 : i32
    return %c0_i32, %c0_i32_0 : i32, i32
  }
  func.func @transform_10(%arg0: i32) -> (i32, i32) {
    %c0_i32 = arith.constant 0 : i32
    %c0_i32_0 = arith.constant 0 : i32
    return %arg0, %c0_i32 : i32, i32
  }
}

</mosaic_0001>

<bundles_post_ra>
// kernel: continuous_mlp_forward.1
= control target key start
LH: loop header
LB: loop body
LE: loop exit
PB: predicated region body
PF: predicated region fallthrough
CT: control target
= control target key end

     0   :  { %s1843_s13 = smov 0   ;;  %s2150_s0 = inlined_call_operand.vmem [shape: f32[256,32], index: 0, kind: input, shape index: {}]   ;;  %s2151_s1 = inlined_call_operand.vmem [shape: bf16[32,256], index: 1, kind: input, shape index: {}]   ;;  %s2152_s2 = inlined_call_operand.vmem [shape: f32[1,256], index: 2, kind: input, shape index: {}]   ;;  %s2153_s3 = inlined_call_operand.vmem [shape: bf16[256,128], index: 3, kind: input, shape index: {}]   ;;  %s2154_s4 = inlined_call_operand.vmem [shape: f32[1,128], index: 4, kind: input, shape index: {}]   ;;  %s2155_s5 = inlined_call_operand.vmem [shape: bf16[128,128], index: 5, kind: input, shape index: {}]   ;;  %s2156_s6 = inlined_call_operand.vmem [shape: f32[1,128], index: 6, kind: input, shape index: {}]   ;;  %s2157_s7 = inlined_call_operand.vmem [shape: bf16[128,128], index: 7, kind: input, shape index: {}]   ;;  %s2158_s8 = inlined_call_operand.vmem [shape: f32[1,128], index: 8, kind: input, shape index: {}]   ;;  %s2159_s9 = inlined_call_operand.vmem [shape: f32[1,128], index: 9, kind: input, shape index: {}]   ;;  %s2160_s10 = inlined_call_operand.vmem [shape: f32[256,128], index: 10, kind: output, shape index: {}]  }
   0x1 LB: > { %s1417_s14 = sadd.s32 4294967295, %s1785_s13   ;;  %p1421_p0 = scmp.ge.s32.totalorder %s1785_s13, 1  ;;  %s1785_s13 = sphi %s1843_s13, %s20_s13  }
   0x2   : > { %p313_p1 = scmp.lt.s32.totalorder %s1785_s13, 3 }
   0x4   : > { %p314_p2 = pnand %p1421_p0, %p313_p1 }
   0x5   : > { %v1677_v0 = vld [vmem:[%s2151_s1 + $0x4] ss:$8 sps:$4 sm:$0xff] (!%p314_p2)   ;;  %s1422_s17 = sshll.u32 (!%p314_p2), %s1417_s14, 4  ;;  %v1679_v1 = vld [vmem:[%s2151_s1] ss:$8 sps:$4 sm:$0xff] (!%p314_p2)   ;;  %v1787_v2 = vmov (!%p314_p2), 0   ;;  %v394_v48 = vlaneseq (!%p314_p2) }
   0x6   : > { %317 = sbr.rel (%p314_p2) target bundleno = 991 (0x3df), region = 60  ;;  %481 = vmatprep.mubr.bf16.mxu0 (!%p314_p2), %v1787_v2  ;;  %p352_p3 = scmp.lt.s32.totalorder (!%p314_p2), %s1422_s17, 31  ;;  %449 = vmatprep.subr.bf16.mxu0 (!%p314_p2), %v1677_v0  ;;  %v1680_v3 = vld [vmem:[%s2151_s1 + $0x14] ss:$8 sps:$4 sm:$0xff] (!%p314_p2)   ;;  %v1682_v4 = vld [vmem:[%s2151_s1 + $0x10] ss:$8 sps:$4 sm:$0xff] (!%p314_p2)  }
   0x7   : > { %450 = vmatpush1.bf16.msra.mxu0 (!%p314_p2), %v1679_v1  ;;  %v1683_v5 = vld [vmem:[%s2153_s3 + $0x40] sm:$0xff] (!%p314_p2)   ;;  %v1685_v7 = vld [vmem:[%s2153_s3 + $0x48] sm:$0xff] (!%p314_p2)   ;;  %vm424_vm0 = vcmask (!%p314_p2), 261120   ;;  %v1687_v14 = vld [vmem:[%s2153_s3 + $0x50] sm:$0xff] (!%p314_p2)   ;;  %v395_v49 = vshrl.u32 (!%p314_p2), %v394_v48, 7 }
   0x8   : > { %451 = vmatprep.subr.bf16.mxu0 (!%p314_p2), %v1680_v3  ;;  %v1684_v6 = vld [vmem:[%s2153_s3] sm:$0xff] (!%p314_p2)   ;;  %1492 = vmatprep.subr.bf16.mxu1 (!%p314_p2), %v1683_v5  ;;  %v1686_v8 = vld [vmem:[%s2153_s3 + $0x8] sm:$0xff] (!%p314_p2)   ;;  %v1688_v15 = vld [vmem:[%s2153_s3 + $0x10] sm:$0xff] (!%p314_p2)  }
   0x9   : > { %1493 = vmatpush3.bf16.msra.mxu1 (!%p314_p2), %v1684_v6  ;;  %v1689_v17 = vld [vmem:[%s2153_s3 + $0x58] sm:$0xff] (!%p314_p2)   ;;  %v1691_v19 = vld [vmem:[%s2153_s3 + $0x60] sm:$0xff] (!%p314_p2)   ;;  %v1693_v23 = vld [vmem:[%s2153_s3 + $0x68] sm:$0xff] (!%p314_p2)   ;;  %v396_v50 = vsub.s32 (!%p314_p2), 0, %v395_v49  ;;  %v400_v52 = vsub.s32 (!%p314_p2), 1, %v395_v49 }
   0xa   : > { %1494 = vmatprep.subr.bf16.mxu1 (!%p314_p2), %v1685_v7  ;;  %v1690_v18 = vld [vmem:[%s2153_s3 + $0x18] sm:$0xff] (!%p314_p2)   ;;  %v1692_v22 = vld [vmem:[%s2153_s3 + $0x20] sm:$0xff] (!%p314_p2)   ;;  %v1694_v40 = vld [vmem:[%s2153_s3 + $0x28] sm:$0xff] (!%p314_p2)  }
   0xb   : > { %452 = vmatpush1.bf16.msra.mxu0 (!%p314_p2), %v1682_v4  ;;  %v1695_v41 = vld [vmem:[%s2153_s3 + $0x70] sm:$0xff] (!%p314_p2)   ;;  %v1697_v43 = vld [vmem:[%s2153_s3 + $0x78] sm:$0xff] (!%p314_p2)   ;;  %v1699_v45 = vld [vmem:[%s2155_s5] sm:$0xff] (!%p314_p2)  }
   0xc   : > { %v1696_v42 = vld [vmem:[%s2153_s3 + $0x30] sm:$0xff] (!%p314_p2)   ;;  %v1698_v44 = vld [vmem:[%s2153_s3 + $0x38] sm:$0xff] (!%p314_p2)   ;;  %v1700_v46 = vld [vmem:[%s2155_s5 + $0x8] sm:$0xff] (!%p314_p2)   ;;  %1588 = vmatprep.subr.bf16.mxu0 (!%p314_p2), %v1699_v45 }
   0xd   : > { %s2162_s17 = smov (!%p352_p3, %s1422_s17), 31  ;;  %1495 = vmatpush3.bf16.msra.mxu1 %v1686_v8  ;;  %v1701_v47 = vld [vmem:[%s2155_s5 + $0x10] sm:$0xff]   ;;  %v392_v51 = vld [vmem:[%s2152_s2] sm:$0x3] }
   0xe   : > { %s1423_s28 = sshll.u32 %s2162_s17, 3  ;;  %1496 = vmatprep.subr.bf16.mxu1 %v1687_v14  ;;  %v1965_v53 = vrot.slane %v392_v51, %v396_v50  ;;  %v1967_v54 = vrot.slane %v392_v51, %v400_v52 }
   0xf   : > { %s1881_s14 = scalar_lea.vmem %s2150_s0, %s1423_s28  ;;  %s2105_s19 = scalar_lea.vmem %s2160_s10, %s1423_s28 }
  0x10   : > { %v364_v9 = vld [vmem:[%s1881_s14] sm:$0xff]  ;;  %v365_v10 = vld [vmem:[%s1881_s14 + $0x8] sm:$0xff]  ;;  %v366_v12 = vld [vmem:[%s1881_s14 + $0x10] sm:$0xff] }
  0x11   : > { %v380_v11 = vpack.c.bf16 %v365_v10, %v364_v9  ;;  %v367_v13 = vld [vmem:[%s1881_s14 + $0x18] sm:$0xff]  ;;  %1497 = vmatpush3.bf16.msra.mxu1 %v1688_v15  ;;  %v368_v20 = vld [vmem:[%s1881_s14 + $0x20] sm:$0xff]  ;;  %v369_v21 = vld [vmem:[%s1881_s14 + $0x28] sm:$0xff] }
  0x12   : > { %v381_v16 = vpack.c.bf16 %v367_v13, %v366_v12  ;;  %1498 = vmatprep.subr.bf16.mxu1 %v1689_v17  ;;  %v382_v24 = vpack.c.bf16 %v369_v21, %v368_v20  ;;  %v370_v25 = vld [vmem:[%s1881_s14 + $0x30] sm:$0xff]  ;;  %v371_v26 = vld [vmem:[%s1881_s14 + $0x38] sm:$0xff]  ;;  %v372_v28 = vld [vmem:[%s1881_s14 + $0x40] sm:$0xff] }
  0x13   : > { %1430 = vmatmul.mubr.msk.bf16.vlgmr.msra.gmra.mrb[0].mxu0 %vm424_vm0, %v380_v11  ;;  %v383_v27 = vpack.c.bf16 %v371_v26, %v370_v25  ;;  %v373_v29 = vld [vmem:[%s1881_s14 + $0x48] sm:$0xff]  ;;  %v374_v31 = vld [vmem:[%s1881_s14 + $0x50] sm:$0xff]  ;;  %v375_v32 = vld [vmem:[%s1881_s14 + $0x58] sm:$0xff] }
  0x14   : > { %491 = vmatprep.mubr.bf16.mxu0 %v1787_v2  ;;  %v384_v30 = vpack.c.bf16 %v373_v29, %v372_v28  ;;  %v385_v33 = vpack.c.bf16 %v375_v32, %v374_v31  ;;  %v376_v34 = vld [vmem:[%s1881_s14 + $0x60] sm:$0xff]  ;;  %v377_v35 = vld [vmem:[%s1881_s14 + $0x68] sm:$0xff]  ;;  %v378_v37 = vld [vmem:[%s1881_s14 + $0x70] sm:$0xff]  ;;  %1589 = vmatpush3.bf16.msra.mxu0 %v1699_v45 }
  0x15   : > { %1499 = vmatpush3.bf16.msra.mxu1 %v1690_v18  ;;  %v386_v36 = vpack.c.bf16 %v377_v35, %v376_v34  ;;  %v379_v38 = vld [vmem:[%s1881_s14 + $0x78] sm:$0xff]  ;;  %1590 = vmatprep.subr.bf16.mxu0 %v1700_v46 }
  0x16   : > { %1500 = vmatprep.subr.bf16.mxu1 %v1691_v19  ;;  %v387_v39 = vpack.c.bf16 %v379_v38, %v378_v37 }
  0x18   : > { %1591 = vmatpush3.bf16.msra.mxu0 %v1700_v46 }
  0x19   : > { %1501 = vmatpush3.bf16.msra.mxu1 %v1692_v22  ;;  %1592 = vmatprep.subr.bf16.mxu0 %v1701_v47 }
  0x1a   : > { %1502 = vmatprep.subr.bf16.mxu1 %v1693_v23 }
  0x1b   : > { %1431 = vmatmul.mubr.msk.bf16.gmra.mrb[4].mxu0 %vm424_vm0, %v381_v16 }
  0x1c   : > { %501 = vmatprep.mubr.bf16.mxu0 %v1787_v2  ;;  %1593 = vmatpush3.bf16.msra.mxu0 %v1701_v47 }
  0x1d   : > { %1503 = vmatpush3.bf16.msra.mxu1 %v1694_v40 }
  0x1e   : > { %1504 = vmatprep.subr.bf16.mxu1 %v1695_v41 }
  0x21   : > { %1505 = vmatpush3.bf16.msra.mxu1 %v1696_v42 }
  0x22   : > { %1506 = vmatprep.subr.bf16.mxu1 %v1697_v43 }
  0x23   : > { %1432 = vmatmul.mubr.msk.bf16.gmra.mrb[8].mxu0 %vm424_vm0, %v382_v24 }
  0x24   : > { %511 = vmatprep.mubr.bf16.mxu0 %v1787_v2 }
  0x25   : > { %1507 = vmatpush3.bf16.msra.mxu1 %v1698_v44 }
  0x2b   : > { %1433 = vmatmul.mubr.msk.bf16.gmra.mrb[12].mxu0 %vm424_vm0, %v383_v27 }
  0x2c   : > { %521 = vmatprep.mubr.bf16.mxu0 %v1787_v2 }
  0x33   : > { %1434 = vmatmul.mubr.msk.bf16.gmra.mrb[16].mxu0 %vm424_vm0, %v384_v30 }
  0x34   : > { %531 = vmatprep.mubr.bf16.mxu0 %v1787_v2 }
  0x3b   : > { %1435 = vmatmul.mubr.msk.bf16.gmra.mrb[20].mxu0 %vm424_vm0, %v385_v33 }
  0x3c   : > { %541 = vmatprep.mubr.bf16.mxu0 %v1787_v2 }
  0x43   : > { %1436 = vmatmul.mubr.msk.bf16.gmra.mrb[24].mxu0 %vm424_vm0, %v386_v36 }
  0x44   : > { %551 = vmatprep.mubr.bf16.mxu0 %v1787_v2 }
  0x4b   : > { %1437 = vmatmul.mubr.msk.bf16.gmra.mrb[28].mxu0 %vm424_vm0, %v387_v39 }
  0xe6   : > { %v483_v55 = vpop.f32.mrb[0].mxu0 }
  0xe7   : > { %v484_v56 = vadd.f32 %v483_v55, %v1965_v53  ;;  %v485_v57 = vpop.f32.mrb[1].mxu0 }
  0xe8   : > { %v486_v58 = vadd.f32 %v485_v57, %v1967_v54  ;;  %v487_v59 = vpop.f32.mrb[2].mxu0 }
  0xe9   : > { %v488_v60 = vadd.f32 %v487_v59, %v1965_v53  ;;  %v489_v61 = vpop.f32.mrb[3].mxu0  ;;  %v562_v63 = vmax.f32 %v484_v56, 0.0 }
  0xea   : > { %v490_v62 = vadd.f32 %v489_v61, %v1967_v54  ;;  %v563_v1 = vmax.f32 %v486_v58, 0.0 }
  0xeb   : > { %v564_v0 = vmax.f32 %v488_v60, 0.0 }
  0xec   : > { %v565_v2 = vmax.f32 %v490_v62, 0.0 }
  0xed   : > { %v594_v3 = vpack.c.bf16 %v564_v0, %v562_v63 }
  0xee   : > { %v493_v4 = vpop.f32.mrb[4].mxu0  ;;  %v595_v5 = vpack.c.bf16 %v565_v2, %v563_v1 }
  0xef   : > { %v494_v6 = vadd.f32 %v493_v4, %v1965_v53  ;;  %v495_v7 = vpop.f32.mrb[5].mxu0 }
  0xf0   : > { %v496_v8 = vadd.f32 %v495_v7, %v1967_v54  ;;  %v497_v9 = vpop.f32.mrb[6].mxu0  ;;  %777 = vmatprep.mubr.bf16.mxu1 %v595_v5 }
  0xf1   : > { %v498_v10 = vadd.f32 %v497_v9, %v1965_v53  ;;  %v499_v11 = vpop.f32.mrb[7].mxu0  ;;  %778 = vmatmul.mubr.bf16.vlgmr.msra.gmra.mrb[0].mxu1 %v594_v3  ;;  %v566_v13 = vmax.f32 %v494_v6, 0.0 }
  0xf2   : > { %v500_v12 = vadd.f32 %v499_v11, %v1967_v54  ;;  %v567_v15 = vmax.f32 %v496_v8, 0.0 }
  0xf3   : > { %v568_v14 = vmax.f32 %v498_v10, 0.0 }
  0xf4   : > { %v569_v16 = vmax.f32 %v500_v12, 0.0 }
  0xf5   : > { %v596_v17 = vpack.c.bf16 %v568_v14, %v566_v13 }
  0xf6   : > { %v597_v18 = vpack.c.bf16 %v569_v16, %v567_v15  ;;  %v503_v19 = vpop.f32.mrb[8].mxu0 }
  0xf7   : > { %v504_v20 = vadd.f32 %v503_v19, %v1965_v53  ;;  %v505_v21 = vpop.f32.mrb[9].mxu0 }
  0xf8   : > { %v506_v22 = vadd.f32 %v505_v21, %v1967_v54  ;;  %v507_v23 = vpop.f32.mrb[10].mxu0  ;;  %785 = vmatprep.mubr.bf16.mxu1 %v597_v18 }
  0xf9   : > { %v508_v24 = vadd.f32 %v507_v23, %v1965_v53  ;;  %v509_v25 = vpop.f32.mrb[11].mxu0  ;;  %786 = vmatmul.mubr.bf16.gmra.mrb[4].mxu1 %v596_v17  ;;  %v570_v27 = vmax.f32 %v504_v20, 0.0 }
  0xfa   : > { %v510_v26 = vadd.f32 %v509_v25, %v1967_v54  ;;  %v571_v29 = vmax.f32 %v506_v22, 0.0 }
  0xfb   : > { %v572_v28 = vmax.f32 %v508_v24, 0.0 }
  0xfc   : > { %v573_v30 = vmax.f32 %v510_v26, 0.0 }
  0xfd   : > { %v598_v31 = vpack.c.bf16 %v572_v28, %v570_v27 }
  0xfe   : > { %v599_v32 = vpack.c.bf16 %v573_v30, %v571_v29  ;;  %v513_v33 = vpop.f32.mrb[12].mxu0 }
  0xff   : > { %v514_v34 = vadd.f32 %v513_v33, %v1965_v53  ;;  %v515_v35 = vpop.f32.mrb[13].mxu0 }
 0x100   : > { %v516_v36 = vadd.f32 %v515_v35, %v1967_v54  ;;  %v517_v37 = vpop.f32.mrb[14].mxu0  ;;  %793 = vmatprep.mubr.bf16.mxu1 %v599_v32 }
 0x101   : > { %v518_v38 = vadd.f32 %v517_v37, %v1965_v53  ;;  %v519_v39 = vpop.f32.mrb[15].mxu0  ;;  %794 = vmatmul.mubr.bf16.gmra.mrb[8].mxu1 %v598_v31  ;;  %v574_v41 = vmax.f32 %v514_v34, 0.0 }
 0x102   : > { %v520_v40 = vadd.f32 %v519_v39, %v1967_v54  ;;  %v575_v43 = vmax.f32 %v516_v36, 0.0 }
 0x103   : > { %v576_v42 = vmax.f32 %v518_v38, 0.0 }
 0x104   : > { %v577_v44 = vmax.f32 %v520_v40, 0.0 }
 0x105   : > { %v600_v45 = vpack.c.bf16 %v576_v42, %v574_v41  ;;  %v1702_v41 = vld [vmem:[%s2155_s5 + $0x18] sm:$0xff]   ;;  %v1705_v42 = vld [vmem:[%s2155_s5 + $0x30] sm:$0xff]  }
 0x106   : > { %v601_v46 = vpack.c.bf16 %v577_v44, %v575_v43  ;;  %v523_v47 = vpop.f32.mrb[16].mxu0  ;;  %1594 = vmatprep.subr.bf16.mxu0 %v1702_v41  ;;  %v1706_v43 = vld [vmem:[%s2155_s5 + $0x38] sm:$0xff]   ;;  %v1707_v44 = vld [vmem:[%s2157_s7] sm:$0xff]  }
 0x107   : > { %v524_v48 = vadd.f32 %v523_v47, %v1965_v53  ;;  %v525_v49 = vpop.f32.mrb[17].mxu0  ;;  %1595 = vmatpush3.bf16.msra.mxu0 %v1702_v41  ;;  %1652 = vmatprep.subr.bf16.mxu1 %v1707_v44  ;;  %v2028_v47 = vld [vmem:[%s2157_s7 + $0x18] sm:$0xff]  }
 0x108   : > { %v526_v50 = vadd.f32 %v525_v49, %v1967_v54  ;;  %v527_v51 = vpop.f32.mrb[18].mxu0  ;;  %801 = vmatprep.mubr.bf16.mxu1 %v601_v46  ;;  %1660 = vmatpush3.bf16.msra.mxu1 %v1707_v44  ;;  %v1709_v46 = vld [vmem:[%s2157_s7 + $0x10] sm:$0xff]   ;;  %v2041_v49 = vld [vmem:[%s2157_s7 + $0x28] sm:$0xff]  }
 0x109   : > { %v528_v52 = vadd.f32 %v527_v51, %v1965_v53  ;;  %v529_v55 = vpop.f32.mrb[19].mxu0  ;;  %802 = vmatmul.mubr.bf16.gmra.mrb[12].mxu1 %v600_v45  ;;  %v578_v57 = vmax.f32 %v524_v48, 0.0  ;;  %v1708_v45 = vld [vmem:[%s2157_s7 + $0x8] sm:$0xff]   ;;  %v2034_v48 = vld [vmem:[%s2157_s7 + $0x20] sm:$0xff]  }
 0x10a   : > { %v530_v56 = vadd.f32 %v529_v55, %v1967_v54  ;;  %v579_v59 = vmax.f32 %v526_v50, 0.0  ;;  %1653 = vmatprep.subr.bf16.mxu1 %v1708_v45  ;;  %v2049_v51 = vld [vmem:[%s2154_s4] ss:$0 sm:$0xff] }
 0x10b   : > { %v580_v58 = vmax.f32 %v528_v52, 0.0 }
 0x10c   : > { %v581_v60 = vmax.f32 %v530_v56, 0.0  ;;  %1661 = vmatpush3.bf16.msra.mxu1 %v1708_v45 }
 0x10d   : > { %v602_v61 = vpack.c.bf16 %v580_v58, %v578_v57  ;;  %1654 = vmatprep.subr.bf16.mxu1 %v1709_v46 }
 0x10e   : > { %v603_v62 = vpack.c.bf16 %v581_v60, %v579_v59  ;;  %v533_v63 = vpop.f32.mrb[20].mxu0 }
 0x10f   : > { %v534_v0 = vadd.f32 %v533_v63, %v1965_v53  ;;  %v535_v1 = vpop.f32.mrb[21].mxu0 }
 0x110   : > { %v536_v2 = vadd.f32 %v535_v1, %v1967_v54  ;;  %v537_v3 = vpop.f32.mrb[22].mxu0  ;;  %809 = vmatprep.mubr.bf16.mxu1 %v603_v62  ;;  %1662 = vmatpush3.bf16.msra.mxu1 %v1709_v46 }
 0x111   : > { %v538_v4 = vadd.f32 %v537_v3, %v1965_v53  ;;  %v539_v5 = vpop.f32.mrb[23].mxu0  ;;  %810 = vmatmul.mubr.bf16.gmra.mrb[16].mxu1 %v602_v61  ;;  %v582_v7 = vmax.f32 %v534_v0, 0.0  ;;  %1655 = vmatprep.subr.bf16.mxu1 %v2028_v47 }
 0x112   : > { %v540_v6 = vadd.f32 %v539_v5, %v1967_v54  ;;  %v583_v9 = vmax.f32 %v536_v2, 0.0 }
 0x113   : > { %v584_v8 = vmax.f32 %v538_v4, 0.0 }
 0x114   : > { %v585_v10 = vmax.f32 %v540_v6, 0.0  ;;  %1663 = vmatpush3.bf16.msra.mxu1 %v2028_v47 }
 0x115   : > { %v604_v11 = vpack.c.bf16 %v584_v8, %v582_v7  ;;  %1656 = vmatprep.subr.bf16.mxu1 %v2034_v48 }
 0x116   : > { %v605_v12 = vpack.c.bf16 %v585_v10, %v583_v9  ;;  %v543_v13 = vpop.f32.mrb[24].mxu0 }
 0x117   : > { %v544_v14 = vadd.f32 %v543_v13, %v1965_v53  ;;  %v545_v15 = vpop.f32.mrb[25].mxu0 }
 0x118   : > { %v546_v16 = vadd.f32 %v545_v15, %v1967_v54  ;;  %v547_v17 = vpop.f32.mrb[26].mxu0  ;;  %817 = vmatprep.mubr.bf16.mxu1 %v605_v12  ;;  %1664 = vmatpush3.bf16.msra.mxu1 %v2034_v48 }
 0x119   : > { %v548_v18 = vadd.f32 %v547_v17, %v1965_v53  ;;  %v549_v19 = vpop.f32.mrb[27].mxu0  ;;  %818 = vmatmul.mubr.bf16.gmra.mrb[20].mxu1 %v604_v11  ;;  %v586_v21 = vmax.f32 %v544_v14, 0.0  ;;  %1657 = vmatprep.subr.bf16.mxu1 %v2041_v49 }
 0x11a   : > { %v550_v20 = vadd.f32 %v549_v19, %v1967_v54  ;;  %v587_v23 = vmax.f32 %v546_v16, 0.0 }
 0x11b   : > { %v588_v22 = vmax.f32 %v548_v18, 0.0 }
 0x11c   : > { %v589_v24 = vmax.f32 %v550_v20, 0.0  ;;  %1665 = vmatpush3.bf16.msra.mxu1 %v2041_v49 }
 0x11d   : > { %v606_v25 = vpack.c.bf16 %v588_v22, %v586_v21 }
 0x11e   : > { %v607_v26 = vpack.c.bf16 %v589_v24, %v587_v23  ;;  %v553_v27 = vpop.f32.mrb[28].mxu0 }
 0x11f   : > { %v554_v28 = vadd.f32 %v553_v27, %v1965_v53  ;;  %v555_v29 = vpop.f32.mrb[29].mxu0 }
 0x120   : > { %v556_v30 = vadd.f32 %v555_v29, %v1967_v54  ;;  %v557_v31 = vpop.f32.mrb[30].mxu0  ;;  %825 = vmatprep.mubr.bf16.mxu1 %v607_v26 }
 0x121   : > { %v558_v32 = vadd.f32 %v557_v31, %v1965_v53  ;;  %v559_v33 = vpop.f32.mrb[31].mxu0  ;;  %826 = vmatmul.mubr.bf16.gmra.mrb[24].mxu1 %v606_v25  ;;  %v590_v35 = vmax.f32 %v554_v28, 0.0  ;;  %v1703_v53 = vld [vmem:[%s2155_s5 + $0x20] sm:$0xff]  }
 0x122   : > { %v560_v34 = vadd.f32 %v559_v33, %v1967_v54  ;;  %v591_v37 = vmax.f32 %v556_v30, 0.0  ;;  %1596 = vmatprep.subr.bf16.mxu0 %v1703_v53  ;;  %v1704_v54 = vld [vmem:[%s2155_s5 + $0x28] sm:$0xff]  }
 0x123   : > { %v592_v36 = vmax.f32 %v558_v32, 0.0  ;;  %1597 = vmatpush3.bf16.msra.mxu0 %v1703_v53 }
 0x124   : > { %v593_v38 = vmax.f32 %v560_v34, 0.0  ;;  %1598 = vmatprep.subr.bf16.mxu0 %v1704_v54 }
 0x125   : > { %v608_v39 = vpack.c.bf16 %v592_v36, %v590_v35 }
 0x126   : > { %v609_v40 = vpack.c.bf16 %v593_v38, %v591_v37 }
 0x127   : > { %1599 = vmatpush3.bf16.msra.mxu0 %v1704_v54 }
 0x128   : > { %833 = vmatprep.mubr.bf16.mxu1 %v609_v40  ;;  %1600 = vmatprep.subr.bf16.mxu0 %v1705_v42 }
 0x129   : > { %834 = vmatmul.mubr.bf16.gmra.mrb[28].mxu1 %v608_v39 }
 0x12b   : > { %1601 = vmatpush3.bf16.msra.mxu0 %v1705_v42 }
 0x12c   : > { %1602 = vmatprep.subr.bf16.mxu0 %v1706_v43 }
 0x12f   : > { %1603 = vmatpush3.bf16.msra.mxu0 %v1706_v43 }
 0x130   : > { %1620 = vmatprep.subr.bf16.mxu0 %v1707_v44 }
 0x1c4   : > { %v1508_v50 = vpop.f32.mrb[0].mxu1 }
 0x1c5   : > { %v1509_v52 = vpop.f32.mrb[1].mxu1 }
 0x1c6   : > { %v1510_v55 = vadd.f32 %v1509_v52, %v1508_v50  ;;  %v1511_v56 = vpop.f32.mrb[2].mxu1 }
 0x1c7   : > { %v1512_v57 = vpop.f32.mrb[3].mxu1 }
 0x1c8   : > { %v780_v58 = vadd.f32 %v1510_v55, %v2049_v51  ;;  %v1513_v59 = vadd.f32 %v1512_v57, %v1511_v56 }
 0x1ca   : > { %v783_v60 = vadd.f32 %v1513_v59, %v2049_v51  ;;  %v842_v61 = vmax.f32 %v780_v58, 0.0 }
 0x1cc   : > { %v843_v62 = vmax.f32 %v783_v60, 0.0  ;;  %v1514_v63 = vpop.f32.mrb[4].mxu1 }
 0x1cd   : > { %v1515_v0 = vpop.f32.mrb[5].mxu1 }
 0x1ce   : > { %v1516_v1 = vadd.f32 %v1515_v0, %v1514_v63  ;;  %v1517_v2 = vpop.f32.mrb[6].mxu1  ;;  %v858_v3 = vpack.c.bf16 %v843_v62, %v842_v61 }
 0x1cf   : > { %v1518_v4 = vpop.f32.mrb[7].mxu1 }
 0x1d0   : > { %v788_v5 = vadd.f32 %v1516_v1, %v2049_v51  ;;  %v1519_v6 = vadd.f32 %v1518_v4, %v1517_v2  ;;  %1604 = vmatprep.mubr.bf16.mxu0 %v858_v3 }
 0x1d2   : > { %v791_v7 = vadd.f32 %v1519_v6, %v2049_v51  ;;  %v844_v8 = vmax.f32 %v788_v5, 0.0 }
 0x1d4   : > { %v845_v9 = vmax.f32 %v791_v7, 0.0  ;;  %v1520_v10 = vpop.f32.mrb[8].mxu1 }
 0x1d5   : > { %v1521_v11 = vpop.f32.mrb[9].mxu1 }
 0x1d6   : > { %v859_v12 = vpack.c.bf16 %v845_v9, %v844_v8  ;;  %v1522_v13 = vadd.f32 %v1521_v11, %v1520_v10  ;;  %v1523_v14 = vpop.f32.mrb[10].mxu1 }
 0x1d7   : > { %v1524_v15 = vpop.f32.mrb[11].mxu1 }
 0x1d8   : > { %v796_v16 = vadd.f32 %v1522_v13, %v2049_v51  ;;  %v1525_v17 = vadd.f32 %v1524_v15, %v1523_v14  ;;  %1605 = vmatmul.mubr.bf16.vlgmr.msra.gmra.mrb[32].mxu0 %v859_v12  ;;  %v1713_v14 = vld [vmem:[%s2157_s7 + $0x30] sm:$0xff]   ;;  %v1714_v15 = vld [vmem:[%s2157_s7 + $0x38] sm:$0xff]  }
 0x1d9   : > { %1621 = vmatpush3.bf16.msra.mxu0 %v1707_v44  ;;  %1658 = vmatprep.subr.bf16.mxu1 %v1713_v14 }
 0x1da   : > { %v799_v18 = vadd.f32 %v1525_v17, %v2049_v51  ;;  %1622 = vmatprep.subr.bf16.mxu0 %v1708_v45  ;;  %v846_v19 = vmax.f32 %v796_v16, 0.0  ;;  %1666 = vmatpush3.bf16.msra.mxu1 %v1713_v14 }
 0x1db   : > { %1659 = vmatprep.subr.bf16.mxu1 %v1714_v15 }
 0x1dc   : > { %v847_v20 = vmax.f32 %v799_v18, 0.0  ;;  %v1526_v21 = vpop.f32.mrb[12].mxu1 }
 0x1dd   : > { %v1527_v22 = vpop.f32.mrb[13].mxu1  ;;  %1623 = vmatpush3.bf16.msra.mxu0 %v1708_v45 }
 0x1de   : > { %v1528_v23 = vadd.f32 %v1527_v22, %v1526_v21  ;;  %v1529_v24 = vpop.f32.mrb[14].mxu1  ;;  %v860_v25 = vpack.c.bf16 %v847_v20, %v846_v19  ;;  %1624 = vmatprep.subr.bf16.mxu0 %v1709_v46  ;;  %1667 = vmatpush3.bf16.msra.mxu1 %v1714_v15 }
 0x1df   : > { %v1530_v26 = vpop.f32.mrb[15].mxu1 }
 0x1e0   : > { %v804_v27 = vadd.f32 %v1528_v23, %v2049_v51  ;;  %v1531_v28 = vadd.f32 %v1530_v26, %v1529_v24  ;;  %1608 = vmatprep.mubr.bf16.mxu0 %v860_v25 }
 0x1e1   : > { %1625 = vmatpush3.bf16.msra.mxu0 %v1709_v46 }
 0x1e2   : > { %v807_v29 = vadd.f32 %v1531_v28, %v2049_v51  ;;  %1626 = vmatprep.subr.bf16.mxu0 %v2028_v47  ;;  %v848_v30 = vmax.f32 %v804_v27, 0.0 }
 0x1e4   : > { %v849_v31 = vmax.f32 %v807_v29, 0.0  ;;  %v1532_v32 = vpop.f32.mrb[16].mxu1 }
 0x1e5   : > { %v1533_v33 = vpop.f32.mrb[17].mxu1  ;;  %1627 = vmatpush3.bf16.msra.mxu0 %v2028_v47 }
 0x1e6   : > { %v1534_v34 = vadd.f32 %v1533_v33, %v1532_v32  ;;  %v1535_v35 = vpop.f32.mrb[18].mxu1  ;;  %v861_v36 = vpack.c.bf16 %v849_v31, %v848_v30  ;;  %1628 = vmatprep.subr.bf16.mxu0 %v2034_v48 }
 0x1e7   : > { %v1536_v37 = vpop.f32.mrb[19].mxu1 }
 0x1e8   : > { %v812_v38 = vadd.f32 %v1534_v34, %v2049_v51  ;;  %v1537_v39 = vadd.f32 %v1536_v37, %v1535_v35  ;;  %1609 = vmatmul.mubr.bf16.gmra.mrb[36].mxu0 %v861_v36 }
 0x1e9   : > { %1629 = vmatpush3.bf16.msra.mxu0 %v2034_v48 }
 0x1ea   : > { %v815_v40 = vadd.f32 %v1537_v39, %v2049_v51  ;;  %1630 = vmatprep.subr.bf16.mxu0 %v2041_v49  ;;  %v850_v41 = vmax.f32 %v812_v38, 0.0 }
 0x1ec   : > { %v851_v53 = vmax.f32 %v815_v40, 0.0  ;;  %v1538_v54 = vpop.f32.mrb[20].mxu1 }
 0x1ed   : > { %v1539_v42 = vpop.f32.mrb[21].mxu1  ;;  %1631 = vmatpush3.bf16.msra.mxu0 %v2041_v49 }
 0x1ee   : > { %v1540_v43 = vadd.f32 %v1539_v42, %v1538_v54  ;;  %v1541_v44 = vpop.f32.mrb[22].mxu1  ;;  %v862_v45 = vpack.c.bf16 %v851_v53, %v850_v41  ;;  %1632 = vmatprep.subr.bf16.mxu0 %v1713_v14 }
 0x1ef   : > { %v1542_v46 = vpop.f32.mrb[23].mxu1 }
 0x1f0   : > { %v820_v47 = vadd.f32 %v1540_v43, %v2049_v51  ;;  %v1543_v50 = vadd.f32 %v1542_v46, %v1541_v44  ;;  %1612 = vmatprep.mubr.bf16.mxu0 %v862_v45 }
 0x1f1   : > { %1633 = vmatpush3.bf16.msra.mxu0 %v1713_v14 }
 0x1f2   : > { %v823_v48 = vadd.f32 %v1543_v50, %v2049_v51  ;;  %v852_v52 = vmax.f32 %v820_v47, 0.0  ;;  %1634 = vmatprep.subr.bf16.mxu0 %v1714_v15 }
 0x1f4   : > { %v853_v55 = vmax.f32 %v823_v48, 0.0  ;;  %v1544_v56 = vpop.f32.mrb[24].mxu1 }
 0x1f5   : > { %v1545_v57 = vpop.f32.mrb[25].mxu1  ;;  %1635 = vmatpush3.bf16.msra.mxu0 %v1714_v15 }
 0x1f6   : > { %v1546_v58 = vadd.f32 %v1545_v57, %v1544_v56  ;;  %v1547_v59 = vpop.f32.mrb[26].mxu1  ;;  %v863_v60 = vpack.c.bf16 %v853_v55, %v852_v52 }
 0x1f7   : > { %v1548_v61 = vpop.f32.mrb[27].mxu1 }
 0x1f8   : > { %v828_v49 = vadd.f32 %v1546_v58, %v2049_v51  ;;  %v1549_v62 = vadd.f32 %v1548_v61, %v1547_v59  ;;  %1613 = vmatmul.mubr.bf16.gmra.mrb[40].mxu0 %v863_v60 }
 0x1fa   : > { %v831_v63 = vadd.f32 %v1549_v62, %v2049_v51  ;;  %v854_v0 = vmax.f32 %v828_v49, 0.0 }
 0x1fc   : > { %v855_v1 = vmax.f32 %v831_v63, 0.0  ;;  %v1550_v2 = vpop.f32.mrb[28].mxu1 }
 0x1fd   : > { %v1551_v3 = vpop.f32.mrb[29].mxu1 }
 0x1fe   : > { %v1552_v4 = vadd.f32 %v1551_v3, %v1550_v2  ;;  %v1553_v5 = vpop.f32.mrb[30].mxu1  ;;  %v864_v6 = vpack.c.bf16 %v855_v1, %v854_v0 }
 0x1ff   : > { %v1554_v7 = vpop.f32.mrb[31].mxu1 }
 0x200   : > { %v836_v8 = vadd.f32 %v1552_v4, %v2049_v51  ;;  %v1555_v9 = vadd.f32 %v1554_v7, %v1553_v5  ;;  %1616 = vmatprep.mubr.bf16.mxu0 %v864_v6 }
 0x202   : > { %v839_v10 = vadd.f32 %v1555_v9, %v2049_v51  ;;  %v856_v11 = vmax.f32 %v836_v8, 0.0  ;;  %v1455_v51 = vld [vmem:[%s2156_s6] ss:$0 sm:$0xff] }
 0x203   : > { %v2085_v9 = vld [vmem:[%s2158_s8] ss:$0 sm:$0xff] }
 0x204   : > { %v857_v12 = vmax.f32 %v839_v10, 0.0 }
 0x206   : > { %v865_v13 = vpack.c.bf16 %v857_v12, %v856_v11 }
 0x208   : > { %1617 = vmatmul.mubr.bf16.gmra.mrb[44].mxu0 %v865_v13 }
 0x2ab   : > { %v1606_v16 = vpop.f32.mrb[32].mxu0 }
 0x2ac   : > { %v980_v17 = vadd.f32 %v1606_v16, %v1455_v51  ;;  %v971_v18 = vpop.f32.mrb[33].mxu0 }
 0x2ad   : > { %v972_v19 = vadd.f32 %v1455_v51, %v971_v18  ;;  %v1607_v20 = vpop.f32.mrb[34].mxu0 }
 0x2ae   : > { %v983_v21 = vadd.f32 %v1607_v20, %v1455_v51  ;;  %v974_v22 = vpop.f32.mrb[35].mxu0  ;;  %v1036_v24 = vmax.f32 %v980_v17, 0.0 }
 0x2af   : > { %v975_v23 = vadd.f32 %v1455_v51, %v974_v22  ;;  %v1034_v26 = vmax.f32 %v972_v19, 0.0 }
 0x2b0   : > { %v1037_v25 = vmax.f32 %v983_v21, 0.0 }
 0x2b1   : > { %v1035_v27 = vmax.f32 %v975_v23, 0.0 }
 0x2b2   : > { %v1051_v28 = vpack.c.bf16 %v1037_v25, %v1036_v24 }
 0x2b3   : > { %v1050_v29 = vpack.c.bf16 %v1035_v27, %v1034_v26 }
 0x2b5   : > { %1636 = vmatprep.mubr.bf16.mxu0 %v1050_v29 }
 0x2b6   : > { %1637 = vmatmul.mubr.bf16.vlgmr.msra.gmra.mrb[48].mxu0 %v1051_v28 }
 0x2bb   : > { %v1610_v30 = vpop.f32.mrb[36].mxu0 }
 0x2bc   : > { %v996_v31 = vadd.f32 %v1610_v30, %v1455_v51  ;;  %v987_v32 = vpop.f32.mrb[37].mxu0 }
 0x2bd   : > { %v988_v33 = vadd.f32 %v1455_v51, %v987_v32  ;;  %v1611_v34 = vpop.f32.mrb[38].mxu0 }
 0x2be   : > { %v999_v35 = vadd.f32 %v1611_v34, %v1455_v51  ;;  %v990_v36 = vpop.f32.mrb[39].mxu0  ;;  %v1040_v38 = vmax.f32 %v996_v31, 0.0 }
 0x2bf   : > { %v991_v37 = vadd.f32 %v1455_v51, %v990_v36  ;;  %v1038_v40 = vmax.f32 %v988_v33, 0.0 }
 0x2c0   : > { %v1041_v39 = vmax.f32 %v999_v35, 0.0 }
 0x2c1   : > { %v1039_v41 = vmax.f32 %v991_v37, 0.0 }
 0x2c2   : > { %v1053_v53 = vpack.c.bf16 %v1041_v39, %v1040_v38 }
 0x2c3   : > { %v1052_v54 = vpack.c.bf16 %v1039_v41, %v1038_v40  ;;  %v2098_v41 = vld [vmem:[%s2159_s9] ss:$0 sm:$0xff] }
 0x2c5   : > { %1640 = vmatprep.mubr.bf16.mxu1 %v1052_v54 }
 0x2c6   : > { %1641 = vmatmul.mubr.bf16.vlgmr.msra.gmra.mrb[32].mxu1 %v1053_v53 }
 0x2cb   : > { %v1614_v42 = vpop.f32.mrb[40].mxu0 }
 0x2cc   : > { %v1012_v43 = vadd.f32 %v1614_v42, %v1455_v51  ;;  %v1003_v44 = vpop.f32.mrb[41].mxu0 }
 0x2cd   : > { %v1004_v45 = vadd.f32 %v1455_v51, %v1003_v44  ;;  %v1615_v46 = vpop.f32.mrb[42].mxu0 }
 0x2ce   : > { %v1015_v47 = vadd.f32 %v1615_v46, %v1455_v51  ;;  %v1006_v50 = vpop.f32.mrb[43].mxu0  ;;  %v1044_v52 = vmax.f32 %v1012_v43, 0.0 }
 0x2cf   : > { %v1007_v48 = vadd.f32 %v1455_v51, %v1006_v50  ;;  %v1042_v56 = vmax.f32 %v1004_v45, 0.0 }
 0x2d0   : > { %v1045_v55 = vmax.f32 %v1015_v47, 0.0 }
 0x2d1   : > { %v1043_v57 = vmax.f32 %v1007_v48, 0.0 }
 0x2d2   : > { %v1055_v58 = vpack.c.bf16 %v1045_v55, %v1044_v52 }
 0x2d3   : > { %v1054_v59 = vpack.c.bf16 %v1043_v57, %v1042_v56 }
 0x2d5   : > { %1644 = vmatprep.mubr.bf16.mxu1 %v1054_v59 }
 0x2d6   : > { %1645 = vmatmul.mubr.bf16.gmra.mrb[36].mxu1 %v1055_v58 }
 0x2db   : > { %v1618_v60 = vpop.f32.mrb[44].mxu0 }
 0x2dc   : > { %v1028_v61 = vadd.f32 %v1618_v60, %v1455_v51  ;;  %v1019_v49 = vpop.f32.mrb[45].mxu0 }
 0x2dd   : > { %v1020_v62 = vadd.f32 %v1455_v51, %v1019_v49  ;;  %v1619_v63 = vpop.f32.mrb[46].mxu0 }
 0x2de   : > { %v1031_v0 = vadd.f32 %v1619_v63, %v1455_v51  ;;  %v1022_v1 = vpop.f32.mrb[47].mxu0  ;;  %v1048_v3 = vmax.f32 %v1028_v61, 0.0 }
 0x2df   : > { %v1023_v2 = vadd.f32 %v1455_v51, %v1022_v1  ;;  %v1046_v5 = vmax.f32 %v1020_v62, 0.0 }
 0x2e0   : > { %v1049_v4 = vmax.f32 %v1031_v0, 0.0 }
 0x2e1   : > { %v1047_v6 = vmax.f32 %v1023_v2, 0.0 }
 0x2e2   : > { %v1057_v7 = vpack.c.bf16 %v1049_v4, %v1048_v3 }
 0x2e3   : > { %v1056_v8 = vpack.c.bf16 %v1047_v6, %v1046_v5 }
 0x2e5   : > { %1648 = vmatprep.mubr.bf16.mxu1 %v1056_v8 }
 0x2e6   : > { %1649 = vmatmul.mubr.bf16.gmra.mrb[40].mxu1 %v1057_v7 }
 0x389   : > { %v1638_v10 = vpop.f32.mrb[48].mxu0 }
 0x38a   : > { %v1172_v11 = vadd.f32 %v1638_v10, %v2085_v9  ;;  %v1163_v12 = vpop.f32.mrb[49].mxu0 }
 0x38b   : > { %v1164_v13 = vadd.f32 %v2085_v9, %v1163_v12  ;;  %v1639_v14 = vpop.f32.mrb[50].mxu0 }
 0x38c   : > { %v1475_v15 = vmul.f32 -1.442695, %v1172_v11  ;;  %v1175_v51 = vadd.f32 %v1639_v14, %v2085_v9  ;;  %v1166_v16 = vpop.f32.mrb[51].mxu0 }
 0x38d   : > { %v1473_v17 = vmul.f32 -1.442695, %v1164_v13  ;;  %v1167_v18 = vadd.f32 %v2085_v9, %v1166_v16 }
 0x38e   : > { %1715 = vpow2.f32 %v1475_v15  ;;  %v1476_v19 = vmul.f32 -1.442695, %v1175_v51 }
 0x38f   : > { %1717 = vpow2.f32 %v1473_v17  ;;  %v1474_v20 = vmul.f32 -1.442695, %v1167_v18 }
 0x390   : > { %1719 = vpow2.f32 %v1476_v19 }
 0x391   : > { %1721 = vpow2.f32 %v1474_v20 }
 0x398   : > { %v1716_v21 = vpop.eup %1715 }
 0x399   : > { %v1718_v22 = vpop.eup %1717  ;;  %v1276_v23 = vadd.f32 1.0, %v1716_v21  ;;  %v1642_v24 = vpop.f32.mrb[32].mxu1 }
 0x39a   : > { %v1720_v25 = vpop.eup %1719  ;;  %v1274_v26 = vadd.f32 1.0, %v1718_v22  ;;  %v1188_v27 = vadd.f32 %v1642_v24, %v2085_v9  ;;  %v1179_v28 = vpop.f32.mrb[33].mxu1 }
 0x39b   : > { %v1722_v29 = vpop.eup %1721  ;;  %1723 = vrcp.f32 %v1276_v23  ;;  %v1277_v30 = vadd.f32 1.0, %v1720_v25  ;;  %v1180_v31 = vadd.f32 %v2085_v9, %v1179_v28  ;;  %v1643_v32 = vpop.f32.mrb[34].mxu1 }
 0x39c   : > { %1725 = vrcp.f32 %v1274_v26  ;;  %v1275_v33 = vadd.f32 1.0, %v1722_v29  ;;  %v1479_v34 = vmul.f32 -1.442695, %v1188_v27  ;;  %v1191_v35 = vadd.f32 %v1643_v32, %v2085_v9  ;;  %v1182_v36 = vpop.f32.mrb[35].mxu1 }
 0x39d   : > { %1727 = vrcp.f32 %v1277_v30  ;;  %v1477_v37 = vmul.f32 -1.442695, %v1180_v31  ;;  %v1183_v38 = vadd.f32 %v2085_v9, %v1182_v36 }
 0x39e   : > { %1729 = vrcp.f32 %v1275_v33  ;;  %v1480_v39 = vmul.f32 -1.442695, %v1191_v35 }
 0x39f   : > { %1731 = vpow2.f32 %v1479_v34  ;;  %v1478_v40 = vmul.f32 -1.442695, %v1183_v38 }
 0x3a0   : > { %1733 = vpow2.f32 %v1477_v37 }
 0x3a1   : > { %1735 = vpow2.f32 %v1480_v39 }
 0x3a2   : > { %1737 = vpow2.f32 %v1478_v40 }
 0x3a5   : > { %v1724_v53 = vpop.eup %1723 }
 0x3a6   : > { %v1726_v54 = vpop.eup %1725  ;;  %v1331_v42 = vmul.f32 %v1724_v53, %v2098_v41 }
 0x3a7   : > { %v1728_v43 = vpop.eup %1727  ;;  %v1329_v44 = vmul.f32 %v1726_v54, %v2098_v41 }
 0x3a8   : > { %v1730_v45 = vpop.eup %1729  ;;  %1347 = vst [vmem:[%s2105_s19 + $0x10] sm:$0xff] %v1331_v42  ;;  %v1332_v46 = vmul.f32 %v1728_v43, %v2098_v41 }
 0x3a9   : > { %v1732_v47 = vpop.eup %1731  ;;  %1345 = vst [vmem:[%s2105_s19] sm:$0xff] %v1329_v44  ;;  %v1330_v50 = vmul.f32 %v1730_v45, %v2098_v41  ;;  %v1646_v48 = vpop.f32.mrb[36].mxu1 }
 0x3aa   : > { %v1734_v52 = vpop.eup %1733  ;;  %1348 = vst [vmem:[%s2105_s19 + $0x18] sm:$0xff] %v1332_v46  ;;  %v1280_v55 = vadd.f32 1.0, %v1732_v47  ;;  %v1204_v56 = vadd.f32 %v1646_v48, %v2085_v9  ;;  %v1195_v57 = vpop.f32.mrb[37].mxu1 }
 0x3ab   : > { %v1736_v58 = vpop.eup %1735  ;;  %1346 = vst [vmem:[%s2105_s19 + $0x8] sm:$0xff] %v1330_v50  ;;  %v1278_v59 = vadd.f32 1.0, %v1734_v52  ;;  %v1196_v60 = vadd.f32 %v2085_v9, %v1195_v57  ;;  %v1647_v61 = vpop.f32.mrb[38].mxu1 }
 0x3ac   : > { %v1738_v49 = vpop.eup %1737  ;;  %1739 = vrcp.f32 %v1280_v55  ;;  %v1281_v62 = vadd.f32 1.0, %v1736_v58  ;;  %v1483_v63 = vmul.f32 -1.442695, %v1204_v56  ;;  %v1207_v0 = vadd.f32 %v1647_v61, %v2085_v9  ;;  %v1198_v1 = vpop.f32.mrb[39].mxu1 }
 0x3ad   : > { %1741 = vrcp.f32 %v1278_v59  ;;  %v1279_v2 = vadd.f32 1.0, %v1738_v49  ;;  %v1481_v3 = vmul.f32 -1.442695, %v1196_v60  ;;  %v1199_v4 = vadd.f32 %v2085_v9, %v1198_v1 }
 0x3ae   : > { %1743 = vrcp.f32 %v1281_v62  ;;  %v1484_v5 = vmul.f32 -1.442695, %v1207_v0 }
 0x3af   : > { %1745 = vrcp.f32 %v1279_v2  ;;  %v1482_v6 = vmul.f32 -1.442695, %v1199_v4 }
 0x3b0   : > { %1747 = vpow2.f32 %v1483_v63 }
 0x3b1   : > { %1749 = vpow2.f32 %v1481_v3 }
 0x3b2   : > { %1751 = vpow2.f32 %v1484_v5 }
 0x3b3   : > { %1753 = vpow2.f32 %v1482_v6 }
 0x3b6   : > { %v1740_v7 = vpop.eup %1739 }
 0x3b7   : > { %v1742_v8 = vpop.eup %1741  ;;  %v1335_v10 = vmul.f32 %v1740_v7, %v2098_v41 }
 0x3b8   : > { %v1744_v11 = vpop.eup %1743  ;;  %v1333_v12 = vmul.f32 %v1742_v8, %v2098_v41 }
 0x3b9   : > { %v1746_v13 = vpop.eup %1745  ;;  %1351 = vst [vmem:[%s2105_s19 + $0x30] sm:$0xff] %v1335_v10  ;;  %v1336_v14 = vmul.f32 %v1744_v11, %v2098_v41  ;;  %v1650_v15 = vpop.f32.mrb[40].mxu1 }
 0x3ba   : > { %v1748_v51 = vpop.eup %1747  ;;  %1349 = vst [vmem:[%s2105_s19 + $0x20] sm:$0xff] %v1333_v12  ;;  %v1334_v16 = vmul.f32 %v1746_v13, %v2098_v41  ;;  %v1220_v17 = vadd.f32 %v1650_v15, %v2085_v9  ;;  %v1211_v18 = vpop.f32.mrb[41].mxu1 }
 0x3bb   : > { %v1750_v19 = vpop.eup %1749  ;;  %1352 = vst [vmem:[%s2105_s19 + $0x38] sm:$0xff] %v1336_v14  ;;  %v1284_v20 = vadd.f32 1.0, %v1748_v51  ;;  %v1212_v21 = vadd.f32 %v2085_v9, %v1211_v18  ;;  %v1651_v22 = vpop.f32.mrb[42].mxu1 }
 0x3bc   : > { %v1752_v23 = vpop.eup %1751  ;;  %1350 = vst [vmem:[%s2105_s19 + $0x28] sm:$0xff] %v1334_v16  ;;  %v1282_v24 = vadd.f32 1.0, %v1750_v19  ;;  %v1223_v25 = vadd.f32 %v1651_v22, %v2085_v9  ;;  %v1214_v26 = vpop.f32.mrb[43].mxu1  ;;  %v1487_v29 = vmul.f32 -1.442695, %v1220_v17 }
 0x3bd   : > { %v1754_v27 = vpop.eup %1753  ;;  %1755 = vrcp.f32 %v1284_v20  ;;  %v1285_v28 = vadd.f32 1.0, %v1752_v23  ;;  %v1215_v30 = vadd.f32 %v2085_v9, %v1214_v26  ;;  %v1485_v32 = vmul.f32 -1.442695, %v1212_v21 }
 0x3be   : > { %1757 = vrcp.f32 %v1282_v24  ;;  %v1283_v31 = vadd.f32 1.0, %v1754_v27  ;;  %v1488_v33 = vmul.f32 -1.442695, %v1223_v25 }
 0x3bf   : > { %1759 = vrcp.f32 %v1285_v28  ;;  %v1486_v34 = vmul.f32 -1.442695, %v1215_v30 }
 0x3c0   : > { %1761 = vrcp.f32 %v1283_v31 }
 0x3c1   : > { %1763 = vpow2.f32 %v1487_v29 }
 0x3c2   : > { %1765 = vpow2.f32 %v1485_v32 }
 0x3c3   : > { %1767 = vpow2.f32 %v1488_v33 }
 0x3c4   : > { %1769 = vpow2.f32 %v1486_v34 }
 0x3c7   : > { %v1756_v35 = vpop.eup %1755 }
 0x3c8   : > { %v1758_v36 = vpop.eup %1757  ;;  %v1339_v37 = vmul.f32 %v1756_v35, %v2098_v41 }
 0x3c9   : > { %v1760_v9 = vpop.eup %1759  ;;  %v1337_v38 = vmul.f32 %v1758_v36, %v2098_v41 }
 0x3ca   : > { %v1762_v39 = vpop.eup %1761  ;;  %1355 = vst [vmem:[%s2105_s19 + $0x50] sm:$0xff] %v1339_v37  ;;  %v1340_v40 = vmul.f32 %v1760_v9, %v2098_v41 }
 0x3cb   : > { %v1764_v53 = vpop.eup %1763  ;;  %1353 = vst [vmem:[%s2105_s19 + $0x40] sm:$0xff] %v1337_v38  ;;  %v1338_v54 = vmul.f32 %v1762_v39, %v2098_v41 }
 0x3cc   : > { %v1766_v42 = vpop.eup %1765  ;;  %1356 = vst [vmem:[%s2105_s19 + $0x58] sm:$0xff] %v1340_v40  ;;  %v1288_v43 = vadd.f32 1.0, %v1764_v53 }
 0x3cd   : > { %v1768_v44 = vpop.eup %1767  ;;  %1354 = vst [vmem:[%s2105_s19 + $0x48] sm:$0xff] %v1338_v54  ;;  %v1286_v45 = vadd.f32 1.0, %v1766_v42 }
 0x3ce   : > { %v1770_v46 = vpop.eup %1769  ;;  %1771 = vrcp.f32 %v1288_v43  ;;  %v1289_v47 = vadd.f32 1.0, %v1768_v44 }
 0x3cf   : > { %1773 = vrcp.f32 %v1286_v45  ;;  %v1287_v50 = vadd.f32 1.0, %v1770_v46 }
 0x3d0   : > { %1775 = vrcp.f32 %v1289_v47 }
 0x3d1   : > { %1777 = vrcp.f32 %v1287_v50 }
 0x3d8   : > { %v1772_v48 = vpop.eup %1771 }
 0x3d9   : > { %v1774_v52 = vpop.eup %1773  ;;  %v1343_v55 = vmul.f32 %v1772_v48, %v2098_v41 }
 0x3da   : > { %v1776_v56 = vpop.eup %1775  ;;  %v1341_v57 = vmul.f32 %v1774_v52, %v2098_v41 }
 0x3db   : > { %v1778_v58 = vpop.eup %1777  ;;  %1359 = vst [vmem:[%s2105_s19 + $0x70] sm:$0xff] %v1343_v55  ;;  %v1344_v59 = vmul.f32 %v1776_v56, %v2098_v41 }
 0x3dc   : > { %1357 = vst [vmem:[%s2105_s19 + $0x60] sm:$0xff] %v1341_v57  ;;  %v1342_v60 = vmul.f32 %v1778_v58, %v2098_v41 }
 0x3dd   : > { %1360 = vst [vmem:[%s2105_s19 + $0x78] sm:$0xff] %v1344_v59 }
 0x3de   : > { %1358 = vst [vmem:[%s2105_s19 + $0x68] sm:$0xff] %v1342_v60 }
 0x3df PF: > { %s20_s13 = sadd.s32 1, %s1785_s13  }
 0x3e0   : > { %p17_p4 = scmp.ge.s32.totalorder %s20_s13, 4  }
 0x3e2   :  { %19 = sbr.rel (!%p17_p4) target bundleno = 1 (0x1), region = 90 }

</bundles_post_ra>
